<compile_context>
chip_gen: v7x
topology: tpu7x:2x2x1
jax: 0.10.0
libtpu: 0.0.40
codegen_flags: <defaults>
</compile_context>

<pallas_src>
import functools

import jax
import jax.numpy as jnp
from jax.experimental import pallas as pl
from jax.experimental.pallas import tpu as pltpu


def _round_up(n: int, m: int) -> int:
    return ((n + m - 1) // m) * m


def _cdiv(a: int, b: int) -> int:
    return (a + b - 1) // b


# ----------------------------------------------------------------------------
# Kernel
# ----------------------------------------------------------------------------
def _mlp_fused_kernel(x_ref, *refs, num_layers: int):
    """refs = (w0, b0, w1, b1, ..., w_{L-1}, b_{L-1}, o_ref).

    x_ref : [tm, in_pad0]          bf16
    w_l   : [in_pad_l, out_pad_l]  bf16 (zero-padded)
    b_l   : [1, out_pad_l]         f32  (zero-padded)
    o_ref : [tm, out_pad_last]     f32
    """
    o_ref = refs[-1]
    wb = refs[:-1]

    x = x_ref[...]                                   # bf16 activations
    for l in range(num_layers):
        w = wb[2 * l][...]                           # bf16 weights
        b = wb[2 * l + 1][...]                       # f32 bias row
        # bf16 operands on the MXU, f32 accumulation.
        y = jnp.dot(x, w, preferred_element_type=jnp.float32) + b
        if l < num_layers - 1:
            # sigmoid: exp + approx reciprocal both on the EUP (off the VALU).
            s = pl.reciprocal(1.0 + jnp.exp(-y), approx=True)
            x = s.astype(jnp.bfloat16)               # bf16 intermediate
        else:
            x = y                                    # final layer: no activation
    o_ref[...] = x.astype(o_ref.dtype)


# ----------------------------------------------------------------------------
# One-time parameter prep (hoisted out of the per-call path)
# ----------------------------------------------------------------------------
def prepare_mlp_params(params):
    """Cast weights to bf16 / biases to f32 and zero-pad feature dims to 128.

    params: list of (w [in, out], b [out]).
    Returns (padded_params, meta).
    """
    in_dims = [int(w.shape[0]) for w, _ in params]
    out_dims = [int(w.shape[1]) for w, _ in params]
    in_pad = [_round_up(d, 128) for d in in_dims]
    out_pad = [_round_up(d, 128) for d in out_dims]

    padded = []
    for l, (w, b) in enumerate(params):
        # Pad rows/cols MUST be exactly zero (see invariant in the header).
        wp = jnp.zeros((in_pad[l], out_pad[l]), jnp.bfloat16)
        wp = wp.at[:in_dims[l], :out_dims[l]].set(w.astype(jnp.bfloat16))
        bp = jnp.zeros((1, out_pad[l]), jnp.float32)
        bp = bp.at[0, :out_dims[l]].set(b.astype(jnp.float32))
        padded.append((wp, bp))

    meta = dict(in_dims=in_dims, out_dims=out_dims, in_pad=in_pad, out_pad=out_pad)
    return padded, meta


# ----------------------------------------------------------------------------
# Forward wrapper
# ----------------------------------------------------------------------------
def mlp_forward(x, padded_params, meta, *, tm_max: int = 1024):
    """x: [..., input_dim] -> [..., output_dim] using pre-padded params."""
    lead_shape = x.shape[:-1]
    in_dims, out_dims = meta["in_dims"], meta["out_dims"]
    in_pad, out_pad = meta["in_pad"], meta["out_pad"]
    d0 = x.shape[-1]
    assert d0 == in_dims[0], "input feature dim mismatch"
    L = len(padded_params)

    x2d = x.reshape(-1, d0)
    M = x2d.shape[0]

    # --- tile size over M: balanced tiles (minimal padding waste), multiple of
    #     16 rows (bf16 sublane tile), >=2 grid steps when M allows so the
    #     'parallel' axis shards across both v7x TensorCores.
    n_tiles = _cdiv(M, max(16, tm_max))
    if n_tiles == 1 and M >= 32:
        n_tiles = 2
    tm = _round_up(_cdiv(M, n_tiles), 16)

    # --- VMEM budget check (conservative for v7x: 64 MiB physical per TC).
    weight_bytes = sum(ip * op * 2 for ip, op in zip(in_pad, out_pad))
    bias_bytes = sum(op * 4 for op in out_pad)
    resident_bytes = weight_bytes + bias_bytes        # single-buffered residents

    def _step_bytes(t):
        io = 2 * (t * in_pad[0] * 2) + 2 * (t * out_pad[-1] * 4)  # dbl-buffered I/O
        inter = 2 * t * max(out_pad) * 4                          # intermediates headroom
        return io + inter

    VMEM_BUDGET = 48 * 1024 * 1024
    # TODO(synk): if resident weights alone exceed the budget (very large hidden
    # dims on v7x), tile the widest layer's N dim / split into per-layer calls.
    assert resident_bytes < VMEM_BUDGET, "resident weights exceed VMEM budget"
    while tm > 16 and resident_bytes + _step_bytes(tm) > VMEM_BUDGET:
        tm = max(16, _round_up(tm // 2, 16))

    M_pad = _round_up(M, tm)

    # --- pad the activation stream once per call, in bf16 (half the HBM bytes).
    x_pad = jnp.zeros((M_pad, in_pad[0]), jnp.bfloat16)
    x_pad = x_pad.at[:M, :d0].set(x2d.astype(jnp.bfloat16))

    flat_inputs = [x_pad]
    in_specs = [pl.BlockSpec((tm, in_pad[0]), lambda i: (i, 0))]
    for l, (wp, bp) in enumerate(padded_params):
        flat_inputs += [wp, bp]
        # Resident (constant-index) blocks: single-buffered to halve VMEM use.
        in_specs += [
            pl.BlockSpec((in_pad[l], out_pad[l]), lambda i: (0, 0),
                         pipeline_mode=pl.Buffered(1)),
            pl.BlockSpec((1, out_pad[l]), lambda i: (0, 0),
                         pipeline_mode=pl.Buffered(1)),
        ]

    # --- cost estimate for XLA scheduling around the custom call.
    flops = 2 * M_pad * sum(ip * op for ip, op in zip(in_pad, out_pad))
    transcendentals = M_pad * sum(out_pad[:-1])
    bytes_accessed = (M_pad * in_pad[0] * 2 + weight_bytes + bias_bytes
                      + M_pad * out_pad[-1] * 4)

    vmem_limit = min(int((resident_bytes + _step_bytes(tm)) * 1.5) + (2 << 20),
                     64 << 20)

    kernel = functools.partial(_mlp_fused_kernel, num_layers=L)

    y_pad = pl.pallas_call(
        kernel,
        out_shape=jax.ShapeDtypeStruct((M_pad, out_pad[-1]), jnp.float32),
        grid=(M_pad // tm,),
        in_specs=in_specs,
        out_specs=pl.BlockSpec((tm, out_pad[-1]), lambda i: (i, 0)),
        compiler_params=pltpu.CompilerParams(
            dimension_semantics=("parallel",),
            vmem_limit_bytes=vmem_limit),
        cost_estimate=pl.CostEstimate(
            flops=flops,
            transcendentals=transcendentals,
            bytes_accessed=bytes_accessed),
    )(*flat_inputs)

    y = y_pad[:M, :out_dims[-1]]
    return y.reshape(*lead_shape, out_dims[-1]).astype(x.dtype)


# ----------------------------------------------------------------------------
# Param init matching nn.Linear shapes (w stored as [in, out])
# ----------------------------------------------------------------------------
def init_mlp_params(key, input_dim, hidden_dim, output_dim, num_layers,
                    dtype=jnp.float32):
    h = [hidden_dim] * (num_layers - 1)
    dims_in = [input_dim] + h
    dims_out = h + [output_dim]
    params = []
    for n, k in zip(dims_in, dims_out):
        key, kw, kb = jax.random.split(key, 3)
        bound = 1.0 / (n ** 0.5)
        w = jax.random.uniform(kw, (n, k), dtype=dtype, minval=-bound, maxval=bound)
        b = jax.random.uniform(kb, (k,), dtype=dtype, minval=-bound, maxval=bound)
        params.append((w, b))
    return params


if __name__ == "__main__":
    key = jax.random.PRNGKey(0)
    k_params, k_x = jax.random.split(key)

    # Small shapes consistent with the module: batch=2, seq(queries)=8,
    # input_dim=16, hidden_dim=32, output_dim=4, num_layers=3.
    input_dim, hidden_dim, output_dim, num_layers = 16, 32, 4, 3
    params = init_mlp_params(k_params, input_dim, hidden_dim, output_dim, num_layers)
    padded_params, meta = prepare_mlp_params(params)   # one-time prep

    x = jax.random.normal(k_x, (2, 8, input_dim), dtype=jnp.float32)

    out = mlp_forward(x, padded_params, meta)
    out = jax.block_until_ready(out)
    assert out.shape == (2, 8, output_dim)

    # Full-f32 reference (kernel uses bf16 weights/activations + approx
    # reciprocal in the sigmoid, so allow a bf16-level tolerance).
    ref = x.reshape(-1, input_dim)
    for i, (w, b) in enumerate(params):
        ref = ref @ w + b
        if i < num_layers - 1:
            ref = jax.nn.sigmoid(ref)
    ref = ref.reshape(2, 8, output_dim)
    max_err = jnp.max(jnp.abs(out - ref))
    assert jnp.allclose(out, ref, atol=5e-2, rtol=5e-2), (
        f"max abs err = {max_err}")

    print("KERNEL_OK")
</pallas_src>

<mosaic_0001>
module attributes {stable_mosaic.version = 11 : i64} {
  func.func @_mlp_fused_kernel(%arg0: i32, %arg1: memref<16x128xbf16, #tpu.memory_space<vmem>>, %arg2: memref<128x128xbf16, #tpu.memory_space<vmem>>, %arg3: memref<1x128xf32, #tpu.memory_space<vmem>>, %arg4: memref<128x128xbf16, #tpu.memory_space<vmem>>, %arg5: memref<1x128xf32, #tpu.memory_space<vmem>>, %arg6: memref<128x128xbf16, #tpu.memory_space<vmem>>, %arg7: memref<1x128xf32, #tpu.memory_space<vmem>>, %arg8: memref<16x128xf32, #tpu.memory_space<vmem>>) attributes {dimension_semantics = [#tpu.dimension_semantics<parallel>], iteration_bounds = array<i64: 1>, scalar_prefetch = 0 : i64, scratch_operands = 0 : i64, tpu.core_type = #tpu.core_type<tc>, window_params = [{transform_indices = @transform_0, window_bounds = array<i64: 16, 128>}, {pipeline_mode = #tpu.pipeline_mode<synchronous>, transform_indices = @transform_1, window_bounds = array<i64: 128, 128>}, {pipeline_mode = #tpu.pipeline_mode<synchronous>, transform_indices = @transform_2, window_bounds = array<i64: 1, 128>}, {pipeline_mode = #tpu.pipeline_mode<synchronous>, transform_indices = @transform_3, window_bounds = array<i64: 128, 128>}, {pipeline_mode = #tpu.pipeline_mode<synchronous>, transform_indices = @transform_4, window_bounds = array<i64: 1, 128>}, {pipeline_mode = #tpu.pipeline_mode<synchronous>, transform_indices = @transform_5, window_bounds = array<i64: 128, 128>}, {pipeline_mode = #tpu.pipeline_mode<synchronous>, transform_indices = @transform_6, window_bounds = array<i64: 1, 128>}, {transform_indices = @transform_7, window_bounds = array<i64: 16, 128>}]} {
    %c0 = arith.constant 0 : index
    %c0_0 = arith.constant 0 : index
    %0 = vector.load %arg1[%c0, %c0_0] : memref<16x128xbf16, #tpu.memory_space<vmem>>, vector<16x128xbf16>
    %c0_1 = arith.constant 0 : index
    %c0_2 = arith.constant 0 : index
    %1 = vector.load %arg2[%c0_1, %c0_2] : memref<128x128xbf16, #tpu.memory_space<vmem>>, vector<128x128xbf16>
    %c0_3 = arith.constant 0 : index
    %c0_4 = arith.constant 0 : index
    %2 = vector.load %arg3[%c0_3, %c0_4] : memref<1x128xf32, #tpu.memory_space<vmem>>, vector<1x128xf32>
    %cst = arith.constant dense<0.000000e+00> : vector<16x128xf32>
    %3 = tpu.matmul %0, %1, %cst {dimension_numbers = #tpu.dot_dimension_numbers<[1], [0], [0], [1], [0, 0, 1, 1], [], []>} : vector<16x128xbf16>, vector<128x128xbf16>, vector<16x128xf32> -> vector<16x128xf32>
    %4 = vector.broadcast %2 : vector<1x128xf32> to vector<16x128xf32>
    %5 = arith.addf %3, %4 : vector<16x128xf32>
    %cst_5 = arith.constant 0.000000e+00 : f32
    %6 = vector.broadcast %cst_5 : f32 to vector<16x128xf32>
    %7 = arith.subf %6, %5 : vector<16x128xf32>
    %8 = math.exp %7 : vector<16x128xf32>
    %cst_6 = arith.constant 1.000000e+00 : f32
    %9 = vector.broadcast %cst_6 : f32 to vector<16x128xf32>
    %10 = arith.addf %9, %8 : vector<16x128xf32>
    %11 = tpu.reciprocal %10 {approx = true} : vector<16x128xf32> -> vector<16x128xf32>
    %12 = arith.truncf %11 : vector<16x128xf32> to vector<16x128xbf16>
    %c0_7 = arith.constant 0 : index
    %c0_8 = arith.constant 0 : index
    %13 = vector.load %arg4[%c0_7, %c0_8] : memref<128x128xbf16, #tpu.memory_space<vmem>>, vector<128x128xbf16>
    %c0_9 = arith.constant 0 : index
    %c0_10 = arith.constant 0 : index
    %14 = vector.load %arg5[%c0_9, %c0_10] : memref<1x128xf32, #tpu.memory_space<vmem>>, vector<1x128xf32>
    %cst_11 = arith.constant dense<0.000000e+00> : vector<16x128xf32>
    %15 = tpu.matmul %12, %13, %cst_11 {dimension_numbers = #tpu.dot_dimension_numbers<[1], [0], [0], [1], [0, 0, 1, 1], [], []>} : vector<16x128xbf16>, vector<128x128xbf16>, vector<16x128xf32> -> vector<16x128xf32>
    %16 = vector.broadcast %14 : vector<1x128xf32> to vector<16x128xf32>
    %17 = arith.addf %15, %16 : vector<16x128xf32>
    %cst_12 = arith.constant 0.000000e+00 : f32
    %18 = vector.broadcast %cst_12 : f32 to vector<16x128xf32>
    %19 = arith.subf %18, %17 : vector<16x128xf32>
    %20 = math.exp %19 : vector<16x128xf32>
    %cst_13 = arith.constant 1.000000e+00 : f32
    %21 = vector.broadcast %cst_13 : f32 to vector<16x128xf32>
    %22 = arith.addf %21, %20 : vector<16x128xf32>
    %23 = tpu.reciprocal %22 {approx = true} : vector<16x128xf32> -> vector<16x128xf32>
    %24 = arith.truncf %23 : vector<16x128xf32> to vector<16x128xbf16>
    %c0_14 = arith.constant 0 : index
    %c0_15 = arith.constant 0 : index
    %25 = vector.load %arg6[%c0_14, %c0_15] : memref<128x128xbf16, #tpu.memory_space<vmem>>, vector<128x128xbf16>
    %c0_16 = arith.constant 0 : index
    %c0_17 = arith.constant 0 : index
    %26 = vector.load %arg7[%c0_16, %c0_17] : memref<1x128xf32, #tpu.memory_space<vmem>>, vector<1x128xf32>
    %cst_18 = arith.constant dense<0.000000e+00> : vector<16x128xf32>
    %27 = tpu.matmul %24, %25, %cst_18 {dimension_numbers = #tpu.dot_dimension_numbers<[1], [0], [0], [1], [0, 0, 1, 1], [], []>} : vector<16x128xbf16>, vector<128x128xbf16>, vector<16x128xf32> -> vector<16x128xf32>
    %28 = vector.broadcast %26 : vector<1x128xf32> to vector<16x128xf32>
    %29 = arith.addf %27, %28 : vector<16x128xf32>
    %c0_19 = arith.constant 0 : index
    %c0_20 = arith.constant 0 : index
    %30 = vector.load %arg8[%c0_19, %c0_20] : memref<16x128xf32, #tpu.memory_space<vmem>>, vector<16x128xf32>
    tpu.vector_store %arg8[%c0_19, %c0_20], %29 {strides = array<i32>} : memref<16x128xf32, #tpu.memory_space<vmem>>, vector<16x128xf32>,
    return
  }
  func.func @transform_0(%arg0: i32) -> (i32, i32) {
    %c0_i32 = arith.constant 0 : i32
    %c0_i32_0 = arith.constant 0 : i32
    return %arg0, %c0_i32 : i32, i32
  }
  func.func @transform_1(%arg0: i32) -> (i32, i32) {
    %c0_i32 = arith.constant 0 : i32
    %c0_i32_0 = arith.constant 0 : i32
    %c0_i32_1 = arith.constant 0 : i32
    return %c0_i32, %c0_i32_0 : i32, i32
  }
  func.func @transform_2(%arg0: i32) -> (i32, i32) {
    %c0_i32 = arith.constant 0 : i32
    %c0_i32_0 = arith.constant 0 : i32
    %c0_i32_1 = arith.constant 0 : i32
    return %c0_i32, %c0_i32_0 : i32, i32
  }
  func.func @transform_3(%arg0: i32) -> (i32, i32) {
    %c0_i32 = arith.constant 0 : i32
    %c0_i32_0 = arith.constant 0 : i32
    %c0_i32_1 = arith.constant 0 : i32
    return %c0_i32, %c0_i32_0 : i32, i32
  }
  func.func @transform_4(%arg0: i32) -> (i32, i32) {
    %c0_i32 = arith.constant 0 : i32
    %c0_i32_0 = arith.constant 0 : i32
    %c0_i32_1 = arith.constant 0 : i32
    return %c0_i32, %c0_i32_0 : i32, i32
  }
  func.func @transform_5(%arg0: i32) -> (i32, i32) {
    %c0_i32 = arith.constant 0 : i32
    %c0_i32_0 = arith.constant 0 : i32
    %c0_i32_1 = arith.constant 0 : i32
    return %c0_i32, %c0_i32_0 : i32, i32
  }
  func.func @transform_6(%arg0: i32) -> (i32, i32) {
    %c0_i32 = arith.constant 0 : i32
    %c0_i32_0 = arith.constant 0 : i32
    %c0_i32_1 = arith.constant 0 : i32
    return %c0_i32, %c0_i32_0 : i32, i32
  }
  func.func @transform_7(%arg0: i32) -> (i32, i32) {
    %c0_i32 = arith.constant 0 : i32
    %c0_i32_0 = arith.constant 0 : i32
    return %arg0, %c0_i32 : i32, i32
  }
}

</mosaic_0001>

<bundles_post_ra>
// kernel: tpu_custom_call.1
= control target key start
LH: loop header
LB: loop body
LE: loop exit
PB: predicated region body
PF: predicated region fallthrough
CT: control target
= control target key end

     0   :  { %12 = vsyncpa [#allocation3], 0  ;;  %s931_s0 = inlined_call_operand.hbm [shape: bf16[16,128], index: 0, kind: input, shape index: {}]   ;;  %s932_s1 = inlined_call_operand.hbm [shape: bf16[128,128], index: 1, kind: input, shape index: {}]   ;;  %s933_s2 = inlined_call_operand.vmem [shape: f32[1,128], index: 2, kind: input, shape index: {}]   ;;  %s934_s3 = inlined_call_operand.hbm [shape: bf16[128,128], index: 3, kind: input, shape index: {}]   ;;  %s935_s4 = inlined_call_operand.vmem [shape: f32[1,128], index: 4, kind: input, shape index: {}]   ;;  %s936_s5 = inlined_call_operand.hbm [shape: bf16[128,128], index: 5, kind: input, shape index: {}]   ;;  %s937_s6 = inlined_call_operand.vmem [shape: f32[1,128], index: 6, kind: input, shape index: {}]   ;;  %s938_s7 = inlined_call_operand.hbm [shape: f32[16,128], index: 7, kind: output, shape index: {}]  }
   0x1   :  { %13 = vsyncpa [#allocation6], 0 }
   0x2   :  { %14 = vsyncpa [#allocation9], 0 }
   0x3   :  { %15 = vsyncpa [#allocation4], 0  ;;  %s755_s24 = smov [#allocation5]   ;;  %s756_s26 = smov [#allocation2]  }
   0x4   :  { %s33_s25 = sshll.u32 %s755_s24, 4  ;;  %s21_s27 = sshll.u32 %s756_s26, 4  ;;  %s34_s25 = int_to_ptr.vmem [resolvable:$true] %s33_s25  ;;  %s806_s27 = int_to_ptr.vmem [resolvable:$true] %s21_s27 }
   0x5   :  { %s637_s30 = scalar_lea.hbm %s932_s1, 1024 }
   0x6   :  { %p638_p0 = scmp.ne.s32.totalorder %s932_s1, %s637_s30  ;;  %p641_p1 = scmp.lt.u32.totalorder %s637_s30, %s932_s1 }
   0x8   :  { %p643_p2 = pnand %p641_p1, %p638_p0 }
   0xa   :  { %646 = shalt.err (!%p643_p2)
}
   0xb   :  { %s647_s12 = scalar_lea.vmem %s34_s25, 1024  ;;  %p652_p4 = scmp.lt.s32.totalorder %s34_s25, %s34_s25 }
   0xc   :  { %p648_p3 = scmp.ne.s32.totalorder %s34_s25, %s647_s12  ;;  %p653_p5 = scmp.lt.s32.totalorder %s647_s12, %s647_s12 }
   0xe   :  { %p654_p6 = por %p653_p5, %p652_p4 }
  0x10   :  { %p655_p7 = pnand %p654_p6, %p648_p3 }
  0x12   :  { %658 = shalt.err (!%p655_p7)
}
  0x13   :  { %s757_s13 = smov 64   ;;  %s758_s14 = smov 4  }
  0x14   :  { %39 = dma.hbm_to_vmem [thread:$0]  %s932_s1, 1024, %s34_s25, [#allocation6], %s757_s13, %s757_s13, %s758_s14  }
  0x15   :  { %s659_s19 = scalar_lea.hbm %s931_s0, 128 }
  0x16   :  { %p660_p8 = scmp.ne.s32.totalorder %s931_s0, %s659_s19  ;;  %p663_p9 = scmp.lt.u32.totalorder %s659_s19, %s931_s0 }
  0x18   :  { %p665_p10 = pnand %p663_p9, %p660_p8 }
  0x1a   :  { %668 = shalt.err (!%p665_p10)
}
  0x1b   :  { %s669_s24 = scalar_lea.vmem %s806_s27, 128  ;;  %p674_p12 = scmp.lt.s32.totalorder %s806_s27, %s806_s27 }
  0x1c   :  { %p670_p11 = scmp.ne.s32.totalorder %s806_s27, %s669_s24  ;;  %p675_p13 = scmp.lt.s32.totalorder %s669_s24, %s669_s24 }
  0x1e   :  { %p676_p0 = por %p675_p13, %p674_p12 }
  0x20   :  { %p677_p1 = pnand %p676_p0, %p670_p11 }
  0x22   :  { %680 = shalt.err (!%p677_p1)
}
  0x23   :  { %27 = dma.hbm_to_vmem [thread:$0]  %s931_s0, 128, %s806_s27, [#allocation3], %s757_s13, %s757_s13, %s758_s14  }
  0x24   :  { %s759_s26 = smov [#allocation7]   ;;  %s760_s29 = smov [#allocation8]  }
  0x25   :  { %s47_s28 = sshll.u32 %s759_s26, 4  ;;  %s61_s30 = sshll.u32 %s760_s29, 4  ;;  %s48_s28 = int_to_ptr.vmem [resolvable:$true] %s47_s28  ;;  %s843_s30 = int_to_ptr.vmem [resolvable:$true] %s61_s30 }
  0x26   :  { %s681_s10 = scalar_lea.hbm %s934_s3, 1024 }
  0x27   :  { %p682_p2 = scmp.ne.s32.totalorder %s934_s3, %s681_s10  ;;  %p685_p3 = scmp.lt.u32.totalorder %s681_s10, %s934_s3 }
  0x29   :  { %p687_p4 = pnand %p685_p3, %p682_p2 }
  0x2b   :  { %690 = shalt.err (!%p687_p4)
}
  0x2c   :  { %s691_s0 = scalar_lea.vmem %s48_s28, 1024  ;;  %p696_p6 = scmp.lt.s32.totalorder %s48_s28, %s48_s28 }
  0x2d   :  { %p692_p5 = scmp.ne.s32.totalorder %s48_s28, %s691_s0  ;;  %p697_p7 = scmp.lt.s32.totalorder %s691_s0, %s691_s0 }
  0x2f   :  { %p698_p8 = por %p697_p7, %p696_p6 }
  0x31   :  { %p699_p9 = pnand %p698_p8, %p692_p5 }
  0x33   :  { %702 = shalt.err (!%p699_p9)
}
  0x34   :  { %53 = dma.hbm_to_vmem [thread:$0]  %s934_s3, 1024, %s48_s28, [#allocation6], %s757_s13, %s757_s13, %s758_s14  }
  0x35   :  { %s703_s20 = scalar_lea.hbm %s936_s5, 1024 }
  0x36   :  { %p704_p10 = scmp.ne.s32.totalorder %s936_s5, %s703_s20  ;;  %p707_p11 = scmp.lt.u32.totalorder %s703_s20, %s936_s5 }
  0x38   :  { %p709_p12 = pnand %p707_p11, %p704_p10 }
  0x3a   :  { %712 = shalt.err (!%p709_p12)
}
  0x3b   :  { %s713_s1 = scalar_lea.vmem %s843_s30, 1024  ;;  %p718_p0 = scmp.lt.s32.totalorder %s843_s30, %s843_s30 }
  0x3c   :  { %p714_p13 = scmp.ne.s32.totalorder %s843_s30, %s713_s1  ;;  %p719_p1 = scmp.lt.s32.totalorder %s713_s1, %s713_s1 }
  0x3e   :  { %p720_p2 = por %p719_p1, %p718_p0 }
  0x40   :  { %p721_p3 = pnand %p720_p2, %p714_p13 }
  0x42   :  { %724 = shalt.err (!%p721_p3)
}
  0x43   :  { %67 = dma.hbm_to_vmem [thread:$0]  %s936_s5, 1024, %s843_s30, [#allocation9], %s757_s13, %s757_s13, %s758_s14  }
  0x44   :  { %747 = dma.done.wait [#allocation3], 128  }
  0x45   :  { %748 = vsyncadd [#allocation3], 4294967168 }
  0x46   :  { %749 = dma.done.wait [#allocation6], 2048  }
  0x47   :  { %750 = vsyncadd [#allocation6], 4294965248 }
  0x48   :  { %751 = dma.done.wait [#allocation9], 1024  }
  0x49   :  { %752 = vsyncadd [#allocation9], 4294966272  ;;  %v761_v0 = vmov 0.0   ;;  %vm762_vm0 = vmmov 0   ;;  %v596_v1 = vld [vmem:[#allocation5] sm:$0xff]   ;;  %v597_v2 = vld [vmem:[#allocation5 + $0x8] sm:$0xff]  }
  0x4a   :  { %525 = vmatprep.subr.bf16.mxu0 %v761_v0  ;;  %541 = vmatprep.mubr.msk.bf16.mxu0 %vm762_vm0, %v761_v0  ;;  %v598_v3 = vld [vmem:[#allocation5 + $0x10] sm:$0xff]   ;;  %v599_v4 = vld [vmem:[#allocation5 + $0x18] sm:$0xff]   ;;  %v600_v5 = vld [vmem:[#allocation5 + $0x20] sm:$0xff]   ;;  %s763_s28 = smov [#allocation10]  }
  0x4b   :  { %545 = vmatprep.subr.bf16.mxu1 %v761_v0  ;;  %561 = vmatprep.mubr.msk.bf16.mxu1 %vm762_vm0, %v761_v0  ;;  %v601_v6 = vld [vmem:[#allocation5 + $0x28] sm:$0xff]   ;;  %v602_v7 = vld [vmem:[#allocation5 + $0x30] sm:$0xff]   ;;  %v603_v8 = vld [vmem:[#allocation5 + $0x38] sm:$0xff]   ;;  %s456_s29 = sshll.u32 %s763_s28, 4  ;;  %s457_s29 = int_to_ptr.vmem [resolvable:$true] %s456_s29 }
  0x4c   :  { %526 = vmatpush3.bf16.msra.mxu0 %v596_v1  ;;  %v604_v9 = vld [vmem:[#allocation2] sm:$0xff]   ;;  %v605_v10 = vld [vmem:[#allocation7] sm:$0xff]   ;;  %v606_v11 = vld [vmem:[#allocation7 + $0x8] sm:$0xff]   ;;  %s725_s30 = scalar_lea.vmem %s457_s29, 256  ;;  %p730_p5 = scmp.lt.s32.totalorder %s457_s29, %s457_s29 }
  0x4d   :  { %527 = vmatprep.subr.bf16.mxu0 %v761_v0  ;;  %546 = vmatpush3.bf16.msra.mxu1 %v605_v10  ;;  %v607_v12 = vld [vmem:[#allocation7 + $0x10] sm:$0xff]   ;;  %v608_v13 = vld [vmem:[#allocation7 + $0x18] sm:$0xff]   ;;  %v609_v14 = vld [vmem:[#allocation7 + $0x20] sm:$0xff]   ;;  %p726_p4 = scmp.ne.s32.totalorder %s457_s29, %s725_s30  ;;  %p731_p6 = scmp.lt.s32.totalorder %s725_s30, %s725_s30 }
  0x4e   :  { %547 = vmatprep.subr.bf16.mxu1 %v761_v0  ;;  %v610_v15 = vld [vmem:[#allocation7 + $0x28] sm:$0xff]   ;;  %v611_v16 = vld [vmem:[#allocation7 + $0x30] sm:$0xff]   ;;  %v612_v17 = vld [vmem:[#allocation7 + $0x38] sm:$0xff]  }
  0x4f   :  { %v470_v18 = vld [vmem:[%s933_s2] ss:$0 sm:$0xff]  ;;  %v613_v36 = vld [vmem:[#allocation8] sm:$0xff]   ;;  %v614_v37 = vld [vmem:[#allocation8 + $0x8] sm:$0xff]   ;;  %p732_p7 = por %p731_p6, %p730_p5 }
  0x50   :  { %528 = vmatpush3.bf16.msra.mxu0 %v597_v2  ;;  %v615_v38 = vld [vmem:[#allocation8 + $0x10] sm:$0xff]   ;;  %v616_v39 = vld [vmem:[#allocation8 + $0x18] sm:$0xff]   ;;  %v617_v40 = vld [vmem:[#allocation8 + $0x20] sm:$0xff]  }
  0x51   :  { %529 = vmatprep.subr.bf16.mxu0 %v761_v0  ;;  %548 = vmatpush3.bf16.msra.mxu1 %v606_v11  ;;  %v618_v41 = vld [vmem:[#allocation8 + $0x28] sm:$0xff]   ;;  %v619_v42 = vld [vmem:[#allocation8 + $0x30] sm:$0xff]   ;;  %v620_v43 = vld [vmem:[#allocation8 + $0x38] sm:$0xff]   ;;  %p733_p8 = pnand %p732_p7, %p726_p4 }
  0x52   :  { %549 = vmatprep.subr.bf16.mxu1 %v761_v0  ;;  %v480_v44 = vld [vmem:[%s935_s4] ss:$0 sm:$0xff] }
  0x53   :  { %v489_v62 = vld [vmem:[%s937_s6] ss:$0 sm:$0xff] }
  0x54   :  { %530 = vmatpush3.bf16.msra.mxu0 %v598_v3 }
  0x55   :  { %531 = vmatprep.subr.bf16.mxu0 %v761_v0  ;;  %550 = vmatpush3.bf16.msra.mxu1 %v607_v12 }
  0x56   :  { %551 = vmatprep.subr.bf16.mxu1 %v761_v0 }
  0x58   :  { %532 = vmatpush3.bf16.msra.mxu0 %v599_v4 }
  0x59   :  { %533 = vmatprep.subr.bf16.mxu0 %v761_v0  ;;  %552 = vmatpush3.bf16.msra.mxu1 %v608_v13 }
  0x5a   :  { %553 = vmatprep.subr.bf16.mxu1 %v761_v0 }
  0x5c   :  { %534 = vmatpush3.bf16.msra.mxu0 %v600_v5 }
  0x5d   :  { %535 = vmatprep.subr.bf16.mxu0 %v761_v0  ;;  %554 = vmatpush3.bf16.msra.mxu1 %v609_v14 }
  0x5e   :  { %555 = vmatprep.subr.bf16.mxu1 %v761_v0 }
  0x60   :  { %536 = vmatpush3.bf16.msra.mxu0 %v601_v6 }
  0x61   :  { %537 = vmatprep.subr.bf16.mxu0 %v761_v0  ;;  %556 = vmatpush3.bf16.msra.mxu1 %v610_v15 }
  0x62   :  { %557 = vmatprep.subr.bf16.mxu1 %v761_v0 }
  0x64   :  { %538 = vmatpush3.bf16.msra.mxu0 %v602_v7 }
  0x65   :  { %539 = vmatprep.subr.bf16.mxu0 %v761_v0  ;;  %558 = vmatpush3.bf16.msra.mxu1 %v611_v16 }
  0x66   :  { %559 = vmatprep.subr.bf16.mxu1 %v761_v0 }
  0x68   :  { %540 = vmatpush3.bf16.msra.mxu0 %v603_v8 }
  0x69   :  { %565 = vmatprep.subr.bf16.mxu0 %v761_v0  ;;  %560 = vmatpush3.bf16.msra.mxu1 %v612_v17 }
  0x6b   :  { %542 = vmatmul.mubr.bf16.vlgmr.msra.gmra.mrb[0].mxu0 %v604_v9 }
  0x6c   :  { %581 = vmatprep.mubr.msk.bf16.mxu0 %vm762_vm0, %v761_v0  ;;  %566 = vmatpush3.bf16.msra.mxu0 %v613_v36 }
  0x6d   :  { %567 = vmatprep.subr.bf16.mxu0 %v761_v0 }
  0x70   :  { %568 = vmatpush3.bf16.msra.mxu0 %v614_v37 }
  0x71   :  { %569 = vmatprep.subr.bf16.mxu0 %v761_v0 }
  0x74   :  { %570 = vmatpush3.bf16.msra.mxu0 %v615_v38 }
  0x75   :  { %571 = vmatprep.subr.bf16.mxu0 %v761_v0 }
  0x78   :  { %572 = vmatpush3.bf16.msra.mxu0 %v616_v39 }
  0x79   :  { %573 = vmatprep.subr.bf16.mxu0 %v761_v0 }
  0x7c   :  { %574 = vmatpush3.bf16.msra.mxu0 %v617_v40 }
  0x7d   :  { %575 = vmatprep.subr.bf16.mxu0 %v761_v0 }
  0x80   :  { %576 = vmatpush3.bf16.msra.mxu0 %v618_v41 }
  0x81   :  { %577 = vmatprep.subr.bf16.mxu0 %v761_v0 }
  0x84   :  { %578 = vmatpush3.bf16.msra.mxu0 %v619_v42 }
  0x85   :  { %579 = vmatprep.subr.bf16.mxu0 %v761_v0 }
  0x88   :  { %580 = vmatpush3.bf16.msra.mxu0 %v620_v43 }
 0x13e   :  { %v196_v19 = vpop.f32.mrb[0].mxu0 }
 0x13f   :  { %v197_v20 = vadd.f32 %v470_v18, %v196_v19  ;;  %v543_v21 = vpop.f32.mrb[1].mxu0 }
 0x140   :  { %v199_v22 = vpop.f32.mrb[2].mxu0 }
 0x141   :  { %v203_v23 = vsub.f32 0.0, %v197_v20  ;;  %v200_v24 = vadd.f32 %v470_v18, %v199_v22  ;;  %v544_v25 = vpop.f32.mrb[3].mxu0 }
 0x143   :  { %v205_v26 = vmul.f32 1.442695, %v203_v23  ;;  %v204_v27 = vsub.f32 0.0, %v200_v24 }
 0x145   :  { %621 = vpow2.f32 %v205_v26  ;;  %v207_v28 = vmul.f32 1.442695, %v204_v27 }
 0x147   :  { %623 = vpow2.f32 %v207_v28 }
 0x14f   :  { %v622_v29 = vpop.eup %621 }
 0x150   :  { %v209_v30 = vadd.f32 1.0, %v622_v29 }
 0x151   :  { %v624_v31 = vpop.eup %623 }
 0x152   :  { %v210_v32 = vadd.f32 1.0, %v624_v31  ;;  %625 = vrcp.f32 %v209_v30 }
 0x154   :  { %627 = vrcp.f32 %v210_v32 }
 0x15c   :  { %v626_v33 = vpop.eup %625 }
 0x15e   :  { %v628_v34 = vpop.eup %627 }
 0x15f   :  { %v213_v35 = vpack.c.bf16 %v628_v34, %v626_v33 }
 0x161   :  { %562 = vmatmul.mubr.bf16.vlgmr.msra.gmra.mrb[0].mxu1 %v213_v35 }
 0x234   :  { %v319_v45 = vpop.f32.mrb[0].mxu1 }
 0x235   :  { %v320_v46 = vadd.f32 %v480_v44, %v319_v45  ;;  %v563_v47 = vpop.f32.mrb[1].mxu1 }
 0x236   :  { %v322_v48 = vpop.f32.mrb[2].mxu1 }
 0x237   :  { %v326_v49 = vsub.f32 0.0, %v320_v46  ;;  %v323_v50 = vadd.f32 %v480_v44, %v322_v48  ;;  %v564_v51 = vpop.f32.mrb[3].mxu1 }
 0x239   :  { %v328_v52 = vmul.f32 1.442695, %v326_v49  ;;  %v327_v53 = vsub.f32 0.0, %v323_v50 }
 0x23b   :  { %629 = vpow2.f32 %v328_v52  ;;  %v330_v54 = vmul.f32 1.442695, %v327_v53 }
 0x23d   :  { %631 = vpow2.f32 %v330_v54 }
 0x245   :  { %v630_v55 = vpop.eup %629 }
 0x246   :  { %v332_v56 = vadd.f32 1.0, %v630_v55 }
 0x247   :  { %v632_v57 = vpop.eup %631 }
 0x248   :  { %v333_v58 = vadd.f32 1.0, %v632_v57  ;;  %633 = vrcp.f32 %v332_v56 }
 0x24a   :  { %635 = vrcp.f32 %v333_v58 }
 0x252   :  { %v634_v59 = vpop.eup %633 }
 0x254   :  { %v636_v60 = vpop.eup %635 }
 0x255   :  { %v336_v61 = vpack.c.bf16 %v636_v60, %v634_v59 }
 0x257   :  { %582 = vmatmul.mubr.bf16.vlgmr.msra.gmra.mrb[4].mxu0 %v336_v61 }
 0x32a   :  { %v442_v63 = vpop.f32.mrb[4].mxu0 }
 0x32b   :  { %v443_v0 = vadd.f32 %v489_v62, %v442_v63  ;;  %v583_v1 = vpop.f32.mrb[5].mxu0 }
 0x32c   :  { %v445_v2 = vpop.f32.mrb[6].mxu0 }
 0x32d   :  { %449 = vst [vmem:[#allocation10] sm:$0xff] %v443_v0  ;;  %v446_v3 = vadd.f32 %v489_v62, %v445_v2  ;;  %v584_v4 = vpop.f32.mrb[7].mxu0 }
 0x32f   :  { %450 = vst [vmem:[#allocation10 + $0x8] sm:$0xff] %v446_v3 }
 0x330   :  { %736 = shalt.err (!%p733_p8)
}
 0x331   :  { %s737_s9 = scalar_lea.hbm %s938_s7, 256 }
 0x332   :  { %p738_p9 = scmp.ne.s32.totalorder %s938_s7, %s737_s9  ;;  %p741_p10 = scmp.lt.u32.totalorder %s737_s9, %s938_s7 }
 0x334   :  { %p743_p11 = pnand %p741_p10, %p738_p9 }
 0x336   :  { %746 = shalt.err (!%p743_p11)
}
 0x337   :  { %s764_s16 = smov 128   ;;  %s765_s0 = smov 8  }
 0x338   :  { %462 = dma.vmem_to_hbm [thread:$0]  %s457_s29, 256, %s938_s7, [#allocation4], %s764_s16, %s764_s16, %s765_s0  }
 0x339   :  { %753 = dma.done.wait [#allocation4], 256  }
 0x33a   :  { %754 = vsyncadd [#allocation4], 4294967040 }
 0x33b   :  { %466 = vsyncpa [#allocation3], 1 }
 0x33c   :  { %467 = vsyncpa [#allocation6], 1 }
 0x33d   :  { %468 = vsyncpa [#allocation9], 1 }
 0x33e   :  { %469 = vsyncpa [#allocation4], 1 }

</bundles_post_ra>
